<compile_context>
chip_gen: v6e
topology: v6e:2x2x1
jax: 0.10.0
libtpu: 0.0.40
codegen_flags: <defaults>
</compile_context>

<pallas_src>
import jax
import jax.numpy as jnp
from jax.experimental import pallas as pl
from jax.experimental.pallas import tpu as pltpu

_LANE = 128
_SUBLANE = 8


def _round_up(x, m):
    return ((x + m - 1) // m) * m


def _choose_t_tile(T, b, target_rows=512):
    """T-tile so that b*tt ~= target_rows, tt a multiple of 8 (or full T),
    keeping at least 2 grid steps when T allows (v7x has 2 TensorCores)."""
    if T <= _SUBLANE:
        return T
    tt = max(_SUBLANE, ((target_rows // max(b, 1)) // _SUBLANE) * _SUBLANE)
    half = _round_up(pl.cdiv(T, 2), _SUBLANE)          # ensure >= 2 grid steps
    tt = min(tt, half)
    return T if tt >= T else tt


def _input_process_kernel(x_ref, w_ref, b_ref, o_ref):
    # x_ref: (b, tt, F)   slab of the ORIGINAL (b, T, F) layout
    # w_ref: (F, Dp)      full weight (transposed, lane-padded), VMEM-resident
    # b_ref: (1, Dp)      float32 bias
    # o_ref: (tt, b, Dp)  slab of the (T, b, Dp) output
    nb, tt, F = x_ref.shape
    w = w_ref[...]
    bias = b_ref[...]

    if tt % _SUBLANE == 0:
        # Merged path: one big MXU matmul over all b*tt rows.  The reshape is
        # a free reinterpretation of the major dims (tt is sublane-aligned).
        rows = x_ref[...].reshape(nb * tt, F)
        acc = jnp.dot(rows, w, preferred_element_type=jnp.float32)
        acc = (acc + bias).astype(o_ref.dtype).reshape(nb, tt, acc.shape[-1])
        # Static unroll over (small) batch: each batch's row-slab is stored
        # into its batch column of the output slab -> the (b,T)->(T,b) permute
        # happens in the store addressing, not as an extra HBM pass.
        for k in range(nb):
            o_ref[:, k, :] = acc[k]
    else:
        # Fallback (tt not sublane-aligned, only tiny T): per-batch matmuls.
        for k in range(nb):
            acc = jnp.dot(x_ref[k], w, preferred_element_type=jnp.float32)
            o_ref[:, k, :] = (acc + bias).astype(o_ref.dtype)


@jax.jit
def input_process(x, weight, bias):
    """
    x:      (b, T, F)   float32 or bfloat16
    weight: (D, F)      PyTorch nn.Linear layout (same dtype family as x)
    bias:   (D,)
    returns (T, b, D)   in x.dtype (float32 accumulation inside the kernel)
    """
    b, T, F = x.shape
    D = weight.shape[0]

    # Lane-dense output: pad D to a multiple of 128 (no-op when already
    # aligned, e.g. the production latent_dim=512).
    Dp = _round_up(D, _LANE)
    w_fd = weight.T                                  # (F, D) - tiny, one-time
    bias_f32 = bias.astype(jnp.float32)
    if Dp != D:
        w_fd = jnp.pad(w_fd, ((0, 0), (0, Dp - D)))
        bias_f32 = jnp.pad(bias_f32, (0, Dp - D))
    bias_2d = bias_f32.reshape(1, Dp)

    tt = _choose_t_tile(T, b)
    grid_t = pl.cdiv(T, tt)

    # Explicit VMEM budget: double-buffered x/out slabs + resident weight/bias.
    x_itm = jnp.dtype(x.dtype).itemsize
    w_itm = jnp.dtype(weight.dtype).itemsize
    est = (2 * b * tt * F * x_itm
           + 2 * tt * b * Dp * x_itm
           + 2 * F * Dp * w_itm
           + 2 * Dp * 4)
    vmem_limit = int(min(max(2 * est, 32 * 1024 * 1024), 48 * 1024 * 1024))

    cost = pl.CostEstimate(
        flops=2 * b * T * F * Dp,
        transcendentals=0,
        bytes_accessed=(b * T * F * x_itm          # x read
                        + F * Dp * w_itm           # weight read
                        + T * b * Dp * x_itm),     # output write
    )

    y = pl.pallas_call(
        _input_process_kernel,
        out_shape=jax.ShapeDtypeStruct((T, b, Dp), x.dtype),
        grid_spec=pltpu.PrefetchScalarGridSpec(
            num_scalar_prefetch=0,
            grid=(grid_t,),
            in_specs=[
                pl.BlockSpec((b, tt, F), lambda i: (0, i, 0)),   # x, original layout
                pl.BlockSpec((F, Dp), lambda i: (0, 0)),         # full weight
                pl.BlockSpec((1, Dp), lambda i: (0, 0)),         # bias
            ],
            out_specs=pl.BlockSpec((tt, b, Dp), lambda i: (i, 0, 0)),
        ),
        compiler_params=pltpu.CompilerParams(
            dimension_semantics=("parallel",),
            vmem_limit_bytes=vmem_limit,
        ),
        cost_estimate=cost,
    )(x, w_fd, bias_2d)

    if Dp != D:
        y = y[..., :D]   # drop lane padding (only when D wasn't 128-aligned)
    return y


def _reference(x, weight, bias):
    xt = jnp.transpose(x.astype(jnp.float32), (1, 0, 2))
    return xt @ weight.astype(jnp.float32).T + bias.astype(jnp.float32)


if __name__ == "__main__":
    key = jax.random.PRNGKey(0)
    k1, k2, k3, k4, k5, k6 = jax.random.split(key, 6)

    # Case 1: float32, (b=2, T=8, F=32, D=64) -- exercises the D->128 lane pad
    # and the single-grid-step path.
    B, T, F, D = 2, 8, 32, 64
    bound = 1.0 / (F ** 0.5)
    x = jax.random.normal(k1, (B, T, F), dtype=jnp.float32)
    w = jax.random.uniform(k2, (D, F), minval=-bound, maxval=bound, dtype=jnp.float32)
    bvec = jax.random.uniform(k3, (D,), minval=-bound, maxval=bound, dtype=jnp.float32)

    out = jax.block_until_ready(input_process(x, w, bvec))
    ref = _reference(x, w, bvec)
    assert out.shape == (T, B, D)
    assert jnp.allclose(out, ref, atol=1e-5, rtol=1e-5)

    # Case 2: bfloat16 inputs (v6e/v7x MXU fast path) + ragged T (T=12 -> two
    # grid steps with a clipped tail block) + merged-matmul path with b=3.
    B2, T2, F2, D2 = 3, 12, 32, 64
    bound2 = 1.0 / (F2 ** 0.5)
    x2 = jax.random.normal(k4, (B2, T2, F2), dtype=jnp.float32).astype(jnp.bfloat16)
    w2 = jax.random.uniform(k5, (D2, F2), minval=-bound2, maxval=bound2,
                            dtype=jnp.float32).astype(jnp.bfloat16)
    b2 = jax.random.uniform(k6, (D2,), minval=-bound2, maxval=bound2,
                            dtype=jnp.float32)

    out2 = jax.block_until_ready(input_process(x2, w2, b2))
    ref2 = _reference(x2, w2, b2)
    assert out2.shape == (T2, B2, D2)
    assert jnp.allclose(out2.astype(jnp.float32), ref2, atol=5e-2, rtol=5e-2)

    print("KERNEL_OK")
</pallas_src>

<mosaic_0001>
module attributes {stable_mosaic.version = 11 : i64} {
  func.func @_input_process_kernel(%arg0: i32, %arg1: memref<2x8x32xf32, #tpu.memory_space<vmem>>, %arg2: memref<32x128xf32, #tpu.memory_space<vmem>>, %arg3: memref<1x128xf32, #tpu.memory_space<vmem>>, %arg4: memref<8x2x128xf32, #tpu.memory_space<vmem>>) attributes {dimension_semantics = [#tpu.dimension_semantics<parallel>], iteration_bounds = array<i64: 1>, scalar_prefetch = 0 : i64, scratch_operands = 0 : i64, tpu.core_type = #tpu.core_type<tc>, window_params = [{transform_indices = @transform_0, window_bounds = array<i64: 2, 8, 32>}, {pipeline_mode = #tpu.pipeline_mode<synchronous>, transform_indices = @transform_1, window_bounds = array<i64: 32, 128>}, {pipeline_mode = #tpu.pipeline_mode<synchronous>, transform_indices = @transform_2, window_bounds = array<i64: 1, 128>}, {transform_indices = @transform_3, window_bounds = array<i64: 8, 2, 128>}]} {
    %c0 = arith.constant 0 : index
    %c0_0 = arith.constant 0 : index
    %0 = vector.load %arg2[%c0, %c0_0] : memref<32x128xf32, #tpu.memory_space<vmem>>, vector<32x128xf32>
    %c0_1 = arith.constant 0 : index
    %c0_2 = arith.constant 0 : index
    %1 = vector.load %arg3[%c0_1, %c0_2] : memref<1x128xf32, #tpu.memory_space<vmem>>, vector<1x128xf32>
    %c0_3 = arith.constant 0 : index
    %c0_4 = arith.constant 0 : index
    %c0_5 = arith.constant 0 : index
    %2 = vector.load %arg1[%c0_3, %c0_4, %c0_5] : memref<2x8x32xf32, #tpu.memory_space<vmem>>, vector<2x8x32xf32>
    %3 = vector.shape_cast %2 : vector<2x8x32xf32> to vector<16x32xf32>
    %cst = arith.constant dense<0.000000e+00> : vector<16x128xf32>
    %4 = tpu.matmul %3, %0, %cst {dimension_numbers = #tpu.dot_dimension_numbers<[1], [0], [0], [1], [0, 0, 1, 1], [], []>} : vector<16x32xf32>, vector<32x128xf32>, vector<16x128xf32> -> vector<16x128xf32>
    %5 = vector.broadcast %1 : vector<1x128xf32> to vector<16x128xf32>
    %6 = arith.addf %4, %5 : vector<16x128xf32>
    %7 = vector.shape_cast %6 : vector<16x128xf32> to vector<2x8x128xf32>
    %8 = vector.extract_strided_slice %7 {offsets = [0, 0, 0], sizes = [1, 8, 128], strides = [1, 1, 1]} : vector<2x8x128xf32> to vector<1x8x128xf32>
    %9 = vector.shape_cast %8 : vector<1x8x128xf32> to vector<8x128xf32>
    %c0_6 = arith.constant 0 : index
    %c0_7 = arith.constant 0 : index
    %c0_8 = arith.constant 0 : index
    %10 = vector.load %arg4[%c0_6, %c0_7, %c0_8] : memref<8x2x128xf32, #tpu.memory_space<vmem>>, vector<8x1x128xf32>
    %11 = vector.shape_cast %10 : vector<8x1x128xf32> to vector<8x128xf32>
    %12 = vector.shape_cast %9 : vector<8x128xf32> to vector<8x1x128xf32>
    tpu.vector_store %arg4[%c0_6, %c0_7, %c0_8], %12 {strides = array<i32>} : memref<8x2x128xf32, #tpu.memory_space<vmem>>, vector<8x1x128xf32>,
    %13 = vector.extract_strided_slice %7 {offsets = [1, 0, 0], sizes = [1, 8, 128], strides = [1, 1, 1]} : vector<2x8x128xf32> to vector<1x8x128xf32>
    %14 = vector.shape_cast %13 : vector<1x8x128xf32> to vector<8x128xf32>
    %c0_9 = arith.constant 0 : index
    %c1 = arith.constant 1 : index
    %c0_10 = arith.constant 0 : index
    %15 = vector.load %arg4[%c0_9, %c1, %c0_10] : memref<8x2x128xf32, #tpu.memory_space<vmem>>, vector<8x1x128xf32>
    %16 = vector.shape_cast %15 : vector<8x1x128xf32> to vector<8x128xf32>
    %17 = vector.shape_cast %14 : vector<8x128xf32> to vector<8x1x128xf32>
    tpu.vector_store %arg4[%c0_9, %c1, %c0_10], %17 {strides = array<i32>} : memref<8x2x128xf32, #tpu.memory_space<vmem>>, vector<8x1x128xf32>,
    return
  }
  func.func @transform_0(%arg0: i32) -> (i32, i32, i32) {
    %c0_i32 = arith.constant 0 : i32
    %c0_i32_0 = arith.constant 0 : i32
    %c0_i32_1 = arith.constant 0 : i32
    return %c0_i32, %arg0, %c0_i32_0 : i32, i32, i32
  }
  func.func @transform_1(%arg0: i32) -> (i32, i32) {
    %c0_i32 = arith.constant 0 : i32
    %c0_i32_0 = arith.constant 0 : i32
    %c0_i32_1 = arith.constant 0 : i32
    return %c0_i32, %c0_i32_0 : i32, i32
  }
  func.func @transform_2(%arg0: i32) -> (i32, i32) {
    %c0_i32 = arith.constant 0 : i32
    %c0_i32_0 = arith.constant 0 : i32
    %c0_i32_1 = arith.constant 0 : i32
    return %c0_i32, %c0_i32_0 : i32, i32
  }
  func.func @transform_3(%arg0: i32) -> (i32, i32, i32) {
    %c0_i32 = arith.constant 0 : i32
    %c0_i32_0 = arith.constant 0 : i32
    %c0_i32_1 = arith.constant 0 : i32
    return %arg0, %c0_i32, %c0_i32_0 : i32, i32, i32
  }
}

</mosaic_0001>

<bundles_post_ra>
// kernel: input_process.1
= control target key start
LH: loop header
LB: loop body
LE: loop exit
PB: predicated region body
PF: predicated region fallthrough
CT: control target
= control target key end

     0   :  { %vm28_vm0 = vcmask 261120   ;;  %s360_s0 = inlined_call_operand.vmem [shape: f32[2,8,32], index: 0, kind: input, shape index: {}]   ;;  %s361_s1 = inlined_call_operand.vmem [shape: f32[32,128], index: 1, kind: input, shape index: {}]   ;;  %s362_s2 = inlined_call_operand.vmem [shape: f32[1,128], index: 2, kind: input, shape index: {}]   ;;  %s363_s3 = inlined_call_operand.hbm [shape: f32[8,2,128], index: 3, kind: output, shape index: {}]  }
   0x1   :  { %v18_v0 = vld [vmem:[%s361_s1 + $0x18] sm:$0xff]  ;;  %v17_v1 = vld [vmem:[%s361_s1 + $0x10] sm:$0xff]  ;;  %v20_v2 = vld [vmem:[%s360_s0] sm:$0xff] }
   0x2   :  { %275 = vmatprep.subr.mxu0 %v18_v0  ;;  %v16_v3 = vld [vmem:[%s361_s1 + $0x8] sm:$0xff]  ;;  %283 = vmatprep.mubr.msk.f32.mxu0 %vm28_vm0, %v20_v2 }
   0x3   :  { %276 = vmatpush3.msra.mxu0 %v18_v0 }
   0x4   :  { %8 = vsyncpa [#allocation3], 0  ;;  %277 = vmatprep.subr.mxu0 %v17_v1  ;;  %v15_v4 = vld [vmem:[%s361_s1] sm:$0xff]  ;;  %v21_v5 = vld [vmem:[%s360_s0 + $0x8] sm:$0xff]  ;;  %v312_v6 = vmov 1966171168   ;;  %v115_v8 = vlaneseq }
   0x5   :  { %278 = vmatpush3.msra.mxu0 %v17_v1  ;;  %v113_v7 = vunpack.c.l.s4 %v312_v6  ;;  %v258_v11 = vld [vmem:[%s362_s2] ss:$0 sm:$0xff]  ;;  %s313_s0 = smov [#allocation2]  }
   0x6   :  { %279 = vmatprep.subr.mxu0 %v16_v3  ;;  %v116_v10 = vshrl.u32 %v115_v8, 7  ;;  %s247_s1 = sshll.u32 %s313_s0, 4  ;;  %s248_s1 = int_to_ptr.vmem [resolvable:$true] %s247_s1 }
   0x7   :  { %280 = vmatpush3.msra.mxu0 %v16_v3  ;;  %v114_v9 = vunpack.c.0.s8 %v113_v7  ;;  %s290_s2 = scalar_lea.vmem %s248_s1, 256  ;;  %p295_p1 = scmp.lt.s32.totalorder %s248_s1, %s248_s1 }
   0x8   :  { %281 = vmatprep.subr.mxu0 %v15_v4  ;;  %p291_p0 = scmp.ne.s32.totalorder %s248_s1, %s290_s2  ;;  %p296_p2 = scmp.lt.s32.totalorder %s290_s2, %s290_s2 }
   0x9   :  { %282 = vmatpush3.msra.mxu0 %v15_v4  ;;  %v117_v12 = vsub.s32 %v114_v9, %v116_v10 }
   0xa   :  { %284 = vmatmul.mubr.msk.f32.vlgmr.msra.gmra.mxu0 %vm28_vm0, %v21_v5  ;;  %p297_p3 = por %p296_p2, %p295_p1 }
   0xc   :  { %p298_p4 = pnand %p297_p3, %p291_p0 }
  0xca   :  { %v285_v13 = vpop.f32.mrf.mxu0 }
  0xcb   :  { %v107_v14 = vadd.f32 %v285_v13, %v258_v11 }
  0xcc   :  { %v101_v15 = vpop.f32.mrf.mxu0 }
  0xcd   :  { %v177_v16 = vcombine.high %v107_v14, %v107_v14  ;;  %v184_v17 = vrot.slane %v107_v14, %v117_v12  ;;  %v102_v18 = vadd.f32 %v258_v11, %v101_v15 }
  0xcf   :  { %v191_v19 = vrot.slane %v177_v16, %v117_v12  ;;  %v192_v20 = vcombine.high %v184_v17, %v184_v17  ;;  %v200_v21 = vrot.slane %v184_v17, %v117_v12  ;;  %265 = vst.sshfl [vmem:[#allocation2 + $0x1] sm:$0x1 pattern:$0x73625140] %v184_v17  ;;  %v111_v22 = vcombine.high %v102_v18, %v102_v18 }
  0xd0   :  { %v118_v23 = vrot.slane %v102_v18, %v117_v12 }
  0xd1   :  { %v193_v24 = vcombine.high %v191_v19, %v191_v19  ;;  %v207_v25 = vrot.slane %v191_v19, %v117_v12  ;;  %v214_v26 = vrot.slane %v192_v20, %v117_v12  ;;  %v222_v27 = vcombine.high %v200_v21, %v200_v21  ;;  %266 = vst.sshfl [vmem:[#allocation2 + $0x3] sm:$0x1 pattern:$0x73625140] %v192_v20 }
  0xd2   :  { %267 = vst.sshfl [vmem:[#allocation2 + $0x9] sm:$0x1 pattern:$0x73625140] %v191_v19  ;;  %v125_v28 = vrot.slane %v111_v22, %v117_v12  ;;  %v126_v29 = vcombine.high %v118_v23, %v118_v23  ;;  %v134_v30 = vrot.slane %v118_v23, %v117_v12 }
  0xd3   :  { %261 = vst.sshfl [vmem:[#allocation2] sm:$0x1 pattern:$0x73625140] %v118_v23  ;;  %v221_v31 = vrot.slane %v193_v24, %v117_v12  ;;  %v223_v32 = vcombine.high %v207_v25, %v207_v25  ;;  %v224_v33 = vcombine.high %v214_v26, %v214_v26  ;;  %236 = vst [vmem:[#allocation2 + $0x5] sm:$0x1] %v222_v27 }
  0xd4   :  { %268 = vst.sshfl [vmem:[#allocation2 + $0xb] sm:$0x1 pattern:$0x73625140] %v193_v24  ;;  %v127_v34 = vcombine.high %v125_v28, %v125_v28  ;;  %v141_v35 = vrot.slane %v125_v28, %v117_v12  ;;  %v148_v36 = vrot.slane %v126_v29, %v117_v12  ;;  %v156_v37 = vcombine.high %v134_v30, %v134_v30 }
  0xd5   :  { %262 = vst.sshfl [vmem:[#allocation2 + $0x2] sm:$0x1 pattern:$0x73625140] %v126_v29  ;;  %v225_v38 = vcombine.high %v221_v31, %v221_v31  ;;  %237 = vst [vmem:[#allocation2 + $0x7] sm:$0x1] %v224_v33 }
  0xd6   :  { %263 = vst.sshfl [vmem:[#allocation2 + $0x8] sm:$0x1 pattern:$0x73625140] %v125_v28  ;;  %240 = vst [vmem:[#allocation2 + $0xd] sm:$0x1] %v223_v32  ;;  %v155_v39 = vrot.slane %v127_v34, %v117_v12  ;;  %v157_v40 = vcombine.high %v141_v35, %v141_v35  ;;  %v158_v41 = vcombine.high %v148_v36, %v148_v36 }
  0xd7   :  { %170 = vst [vmem:[#allocation2 + $0x4] sm:$0x1] %v156_v37  ;;  %264 = vst.sshfl [vmem:[#allocation2 + $0xa] sm:$0x1 pattern:$0x73625140] %v127_v34 }
  0xd8   :  { %241 = vst [vmem:[#allocation2 + $0xf] sm:$0x1] %v225_v38  ;;  %v159_v42 = vcombine.high %v155_v39, %v155_v39  ;;  %171 = vst [vmem:[#allocation2 + $0x6] sm:$0x1] %v158_v41 }
  0xd9   :  { %174 = vst [vmem:[#allocation2 + $0xc] sm:$0x1] %v157_v40 }
  0xda   :  { %175 = vst [vmem:[#allocation2 + $0xe] sm:$0x1] %v159_v42 }
  0xdb   :  { %301 = shalt.err (!%p298_p4)
}
  0xdc   :  { %s314_s26 = smov 32   ;;  %s315_s27 = smov 2  }
  0xdd   :  { %253 = dma.vmem_to_hbm [thread:$0]  %s248_s1, 256, %s363_s3, [#allocation3], %s314_s26, %s314_s26, %s315_s27  }
  0xde   :  { %310 = dma.done.wait [#allocation3], 256  }
  0xdf   :  { %311 = vsyncadd [#allocation3], 4294967040 }
  0xe0   :  { %257 = vsyncpa [#allocation3], 1 }

</bundles_post_ra>
